<compile_context>
chip_gen: v6e
topology: v6e:2x2x1
jax: 0.10.0
libtpu: 0.0.40
codegen_flags: <defaults>
</compile_context>

<pallas_src>
import math

import jax
import jax.numpy as jnp
from jax.experimental import pallas as pl
from jax.experimental.pallas import tpu as pltpu

_MAX_DMAS_IN_FLIGHT = 4


def _lane_dense_factorization(total):
    """Pick (rows, lane) with lane a large multiple of 128 dividing total."""
    for lane in (2048, 1024, 512, 256, 128):
        if total % lane == 0:
            return total // lane, lane
    return None


# ---------------------------------------------------------------------------
# Primary path: direct HBM -> HBM DMA copy (no VMEM staging, no vld/vst).
# ---------------------------------------------------------------------------
def _make_hbm_copy_kernel(chunk_bounds):
    """chunk_bounds: static (start_row, n_rows) pairs along the major axis."""
    single = len(chunk_bounds) == 1

    def kernel(x_hbm, o_hbm, sem):
        copies = []
        for idx, (start, size) in enumerate(chunk_bounds):
            src = x_hbm if single else x_hbm.at[pl.ds(start, size)]
            dst = o_hbm if single else o_hbm.at[pl.ds(start, size)]
            cp = pltpu.make_async_copy(src, dst, sem.at[idx])
            cp.start()                      # all chunks in flight at once
            copies.append(cp)
        for cp in copies:
            cp.wait()

    return kernel


def _pallas_copy_dma(x_flat):
    """Physical identity copy of a 1-D array via chunked HBM->HBM DMAs."""
    total = x_flat.shape[0]
    itemsize = jnp.dtype(x_flat.dtype).itemsize

    fact = _lane_dense_factorization(total)
    if fact is not None:
        rows, lane = fact
        arr = jnp.reshape(x_flat, (rows, lane))        # metadata-only
        n_major = rows
    else:
        arr = x_flat                                   # degenerate size: keep 1-D
        n_major = total

    # Split the major axis into <= _MAX_DMAS_IN_FLIGHT contiguous chunks.
    # Chunk starts stay multiples of 8 rows (tile-aligned in HBM).
    if fact is not None and n_major >= _MAX_DMAS_IN_FLIGHT * 8:
        per = -(-n_major // _MAX_DMAS_IN_FLIGHT)       # ceil
        per = ((per + 7) // 8) * 8
    else:
        per = n_major                                  # single whole-array DMA
    bounds = []
    start = 0
    while start < n_major:
        size = min(per, n_major - start)
        bounds.append((start, size))
        start += size

    out = pl.pallas_call(
        _make_hbm_copy_kernel(tuple(bounds)),
        out_shape=jax.ShapeDtypeStruct(arr.shape, arr.dtype),
        in_specs=[pl.BlockSpec(memory_space=pl.ANY)],
        out_specs=pl.BlockSpec(memory_space=pl.ANY),
        scratch_shapes=[pltpu.SemaphoreType.DMA((len(bounds),))],
        cost_estimate=pl.CostEstimate(
            flops=0, transcendentals=0, bytes_accessed=2 * total * itemsize),
    )(arr)
    return jnp.reshape(out, (total,))                  # metadata-only


# ---------------------------------------------------------------------------
# Fallback path: VMEM-staged, lane-dense tiled copy (~4 MiB tiles).
# ---------------------------------------------------------------------------
def _copy_kernel(x_ref, o_ref):
    # Single whole-tile assignment: lane-dense, unmasked full-vreg stores.
    o_ref[...] = x_ref[...]


def _pallas_copy_vmem(x_flat):
    total = x_flat.shape[0]
    itemsize = jnp.dtype(x_flat.dtype).itemsize
    # Sublane packing: 8 for 4-byte, 16 for bf16/fp16, 32 for int8/fp8.
    pack = max(8, 32 // itemsize)

    fact = _lane_dense_factorization(total)
    if fact is None:
        # Pad to the next multiple of 128 so the copy stays lane-dense and
        # VMEM-bounded (no single giant block), then slice the padding off.
        padded = ((total + 127) // 128) * 128
        x_pad = jnp.pad(x_flat, (0, padded - total))
        return _pallas_copy_vmem(x_pad)[:total]
    rows, lane = fact

    x2d = jnp.reshape(x_flat, (rows, lane))            # metadata-only

    # ~4 MiB tiles: double-buffered in + out = 16 MiB, safe on every
    # generation (incl. v7x's 64 MiB VMEM/TC) under a 32 MiB scoped limit.
    # Keep >=2 grid steps when possible so dimension_semantics=("parallel",)
    # can shard the copy across both v7x TensorCores.
    target_rows = max(1, (4 * 1024 * 1024) // (lane * itemsize))
    if rows <= target_rows:
        if rows >= 2 * pack:
            tile_r = pack * (-(-(rows // 2) // pack))  # ~half, pack-aligned
        else:
            tile_r = rows                              # full dim -> legal block
    else:
        tile_r = max(pack, (target_rows // pack) * pack)

    grid = (pl.cdiv(rows, tile_r),)

    out2d = pl.pallas_call(
        _copy_kernel,
        out_shape=jax.ShapeDtypeStruct((rows, lane), x_flat.dtype),
        grid_spec=pltpu.PrefetchScalarGridSpec(
            num_scalar_prefetch=0,
            grid=grid,
            in_specs=[pl.BlockSpec((tile_r, lane), lambda i: (i, 0))],
            out_specs=pl.BlockSpec((tile_r, lane), lambda i: (i, 0)),
        ),
        compiler_params=pltpu.CompilerParams(
            dimension_semantics=("parallel",),
            vmem_limit_bytes=32 * 1024 * 1024,
        ),
        cost_estimate=pl.CostEstimate(
            flops=0, transcendentals=0, bytes_accessed=2 * total * itemsize),
    )(x2d)
    return jnp.reshape(out2d, (total,))                # metadata-only


# ---------------------------------------------------------------------------
# Public forward: equivalent of torch View(*shape).
# ---------------------------------------------------------------------------
def view_forward(x, shape, physical_copy=False, method="dma"):
    """Returns x reshaped to (-1, *shape).

    Default path is metadata-only (no data movement).  Set physical_copy=True
    to force the bytes through a Pallas copy kernel; method="dma" (default)
    uses direct HBM->HBM DMAs, method="vmem" the staged tiled copy.
    """
    total = math.prod(x.shape)
    tail = math.prod(shape) if shape else 1
    assert total % tail == 0, "input numel not divisible by prod(shape)"
    out_shape = (total // tail,) + tuple(shape)

    if not physical_copy:
        return jnp.reshape(x, out_shape)               # the correct cost: zero

    flat = jnp.reshape(x, (total,))                    # metadata-only
    if method == "vmem":
        out_flat = _pallas_copy_vmem(flat)
    else:
        try:
            out_flat = _pallas_copy_dma(flat)          # primary: HBM->HBM DMA
        except Exception:                              # robust fallback
            out_flat = _pallas_copy_vmem(flat)
    return jnp.reshape(out_flat, out_shape)            # metadata-only


if __name__ == "__main__":
    key = jax.random.PRNGKey(0)
    # Small NCHW-style input consistent with typical use of View.
    x = jax.random.normal(key, (2, 4, 16, 16), dtype=jnp.float32)
    target_shape = (8, 32)                             # View(8, 32)
    ref = jnp.reshape(x, (-1,) + target_shape)

    # 1) Fast (recommended) path: metadata-only reshape, no kernel launch.
    y_fast = view_forward(x, target_shape)
    jax.block_until_ready(y_fast)
    assert y_fast.shape == ref.shape and y_fast.dtype == ref.dtype
    assert bool(jnp.all(y_fast == ref))

    # 2) Physical copy via direct HBM->HBM DMA (single-chunk case).
    y_dma = view_forward(x, target_shape, physical_copy=True)
    jax.block_until_ready(y_dma)
    assert y_dma.shape == ref.shape and y_dma.dtype == ref.dtype
    assert bool(jnp.all(y_dma == ref))

    # 3) Physical copy via the VMEM-staged tiled fallback.
    y_vmem = view_forward(x, target_shape, physical_copy=True, method="vmem")
    jax.block_until_ready(y_vmem)
    assert y_vmem.shape == ref.shape and y_vmem.dtype == ref.dtype
    assert bool(jnp.all(y_vmem == ref))

    # 4) Multi-chunk DMA path (4 DMAs in flight) on a modest 512 KiB input.
    xm = jax.random.normal(jax.random.PRNGKey(0), (8, 16, 32, 32), jnp.float32)
    refm = jnp.reshape(xm, (-1,) + target_shape)
    ym = view_forward(xm, target_shape, physical_copy=True)
    jax.block_until_ready(ym)
    assert ym.shape == refm.shape and bool(jnp.all(ym == refm))

    # 5) Degenerate size (numel not a multiple of 128) through the copy path.
    x2 = jax.random.normal(jax.random.PRNGKey(0), (2, 3, 5, 7), jnp.float32)
    ref2 = jnp.reshape(x2, (-1, 5, 7))
    y2 = view_forward(x2, (5, 7), physical_copy=True)
    jax.block_until_ready(y2)
    assert y2.shape == ref2.shape and bool(jnp.all(y2 == ref2))

    print("KERNEL_OK")
</pallas_src>

<mosaic_0001>
module attributes {stable_mosaic.version = 11 : i64} {
  func.func @kernel(%arg0: memref<1x2048xf32, #tpu.memory_space<any>>, %arg1: memref<1x2048xf32, #tpu.memory_space<any>>, %arg2: memref<1x!tpu.dma_semaphore, #tpu.memory_space<semaphore_mem>>) attributes {dimension_semantics = [], scalar_prefetch = 0 : i64, scratch_operands = 1 : i64, tpu.core_type = #tpu.core_type<tc>} {
    %c0_i32 = arith.constant 0 : i32
    %0 = tpu.memref_slice %arg2[%c0_i32] : memref<1x!tpu.dma_semaphore, #tpu.memory_space<semaphore_mem>> -> memref<1x!tpu.dma_semaphore, #tpu.memory_space<semaphore_mem>>
    %1 = tpu.memref_squeeze %0 : memref<1x!tpu.dma_semaphore, #tpu.memory_space<semaphore_mem>> -> memref<!tpu.dma_semaphore, #tpu.memory_space<semaphore_mem>>
    tpu.enqueue_dma source(%arg0 : memref<1x2048xf32, #tpu.memory_space<any>>) target(%arg1 : memref<1x2048xf32, #tpu.memory_space<any>>) target_semaphore(%1 : memref<!tpu.dma_semaphore, #tpu.memory_space<semaphore_mem>>)
    %c0_i32_0 = arith.constant 0 : i32
    %2 = tpu.memref_slice %arg2[%c0_i32_0] : memref<1x!tpu.dma_semaphore, #tpu.memory_space<semaphore_mem>> -> memref<1x!tpu.dma_semaphore, #tpu.memory_space<semaphore_mem>>
    %3 = tpu.memref_squeeze %2 : memref<1x!tpu.dma_semaphore, #tpu.memory_space<semaphore_mem>> -> memref<!tpu.dma_semaphore, #tpu.memory_space<semaphore_mem>>
    tpu.wait_dma2 semaphore(%3 : memref<!tpu.dma_semaphore, #tpu.memory_space<semaphore_mem>>) src(%arg0 : memref<1x2048xf32, #tpu.memory_space<any>>) dst(%arg1 : memref<1x2048xf32, #tpu.memory_space<any>>)
    return
  }
}

module attributes {stable_mosaic.version = 11 : i64} {
  func.func @_copy_kernel(%arg0: i32, %arg1: memref<1x2048xf32, #tpu.memory_space<vmem>>, %arg2: memref<1x2048xf32, #tpu.memory_space<vmem>>) attributes {dimension_semantics = [#tpu.dimension_semantics<parallel>], iteration_bounds = array<i64: 1>, scalar_prefetch = 0 : i64, scratch_operands = 0 : i64, tpu.core_type = #tpu.core_type<tc>, window_params = [{transform_indices = @transform_0, window_bounds = array<i64: 1, 2048>}, {transform_indices = @transform_1, window_bounds = array<i64: 1, 2048>}]} {
    %c0 = arith.constant 0 : index
    %c0_0 = arith.constant 0 : index
    %0 = vector.load %arg1[%c0, %c0_0] : memref<1x2048xf32, #tpu.memory_space<vmem>>, vector<1x2048xf32>
    %c0_1 = arith.constant 0 : index
    %c0_2 = arith.constant 0 : index
    %1 = vector.load %arg2[%c0_1, %c0_2] : memref<1x2048xf32, #tpu.memory_space<vmem>>, vector<1x2048xf32>
    tpu.vector_store %arg2[%c0_1, %c0_2], %0 {strides = array<i32>} : memref<1x2048xf32, #tpu.memory_space<vmem>>, vector<1x2048xf32>,
    return
  }
  func.func @transform_0(%arg0: i32) -> (i32, i32) {
    %c0_i32 = arith.constant 0 : i32
    %c0_i32_0 = arith.constant 0 : i32
    return %arg0, %c0_i32 : i32, i32
  }
  func.func @transform_1(%arg0: i32) -> (i32, i32) {
    %c0_i32 = arith.constant 0 : i32
    %c0_i32_0 = arith.constant 0 : i32
    return %arg0, %c0_i32 : i32, i32
  }
}

</mosaic_0001>

<bundles_post_ra>
// kernel: tpu_custom_call.1
= control target key start
LH: loop header
LB: loop body
LE: loop exit
PB: predicated region body
PF: predicated region fallthrough
CT: control target
= control target key end

     0   :  { %s28_s6 = smov [#allocation2]   ;;  %s29_s7 = smov 131072   ;;  %s47_s0 = inlined_call_operand.hbm [shape: f32[1,2048], index: 0, kind: input, shape index: {}]   ;;  %s48_s1 = inlined_call_operand.hbm [shape: f32[1,2048], index: 1, kind: output, shape index: {}]  }
   0x1   :  { %s30_s8 = smov 0  }
   0x2   :  { %12 = dma.general %s47_s0, 256, %s48_s1, %s28_s6, %s29_s7, [#allocation4], %s30_s8, 0  }
   0x3   :  { %26 = dma.done.wait [#allocation2], 256 }
   0x4   :  { %27 = vsyncadd [#allocation2], 4294967040 }
   0x5   :  { %16 = vsyncmov [#allocation2] }
   0x8   :  { %s17_s13 = vpop.sfrf %16 }
   0x9   :  { %p22_p0 = scmp.ne.s32.totalorder %s17_s13, 0 }
   0xb   :  { %21 = shalt.err (%p22_p0)  }

// kernel: tpu_custom_call.1
= control target key start
LH: loop header
LB: loop body
LE: loop exit
PB: predicated region body
PF: predicated region fallthrough
CT: control target
= control target key end

     0   :  { %6 = vsyncpa [#allocation3], 0  ;;  %s104_s0 = inlined_call_operand.hbm [shape: f32[1,2048], index: 0, kind: input, shape index: {}]   ;;  %s105_s1 = inlined_call_operand.hbm [shape: f32[1,2048], index: 1, kind: output, shape index: {}]  }
   0x1   :  { %7 = vsyncpa [#allocation4], 0  ;;  %s86_s6 = smov [#allocation2]  }
   0x2   :  { %s14_s7 = sshll.u32 %s86_s6, 4  ;;  %s15_s7 = int_to_ptr.vmem [resolvable:$true] %s14_s7 }
   0x3   :  { %s50_s8 = scalar_lea.vmem %s15_s7, 256  ;;  %p55_p1 = scmp.lt.s32.totalorder %s15_s7, %s15_s7 }
   0x4   :  { %p51_p0 = scmp.ne.s32.totalorder %s15_s7, %s50_s8  ;;  %p56_p2 = scmp.lt.s32.totalorder %s50_s8, %s50_s8 }
   0x6   :  { %p57_p3 = por %p56_p2, %p55_p1 }
   0x8   :  { %p58_p4 = pnand %p57_p3, %p51_p0 }
   0xa   :  { %61 = shalt.err (!%p58_p4)
}
   0xb   :  { %17 = dma.hbm_to_vmem [thread:$0]  %s104_s0, 256, %s15_s7, [#allocation3]  }
   0xc   :  { %82 = dma.done.wait [#allocation3], 256  }
   0xd   :  { %83 = vsyncadd [#allocation3], 4294967040  ;;  %s87_s11 = smov [#allocation5]   ;;  %v21_v0 = vld [vmem:[#allocation2] sm:$0xff]  ;;  %v22_v1 = vld [vmem:[#allocation2 + $0x8] sm:$0xff] }
   0xe   :  { %s31_s12 = sshll.u32 %s87_s11, 4  ;;  %23 = vst [vmem:[#allocation5] sm:$0xff] %v21_v0  ;;  %24 = vst [vmem:[#allocation5 + $0x8] sm:$0xff] %v22_v1  ;;  %s32_s12 = int_to_ptr.vmem [resolvable:$true] %s31_s12 }
   0xf   :  { %s62_s13 = scalar_lea.vmem %s32_s12, 256  ;;  %p67_p6 = scmp.lt.s32.totalorder %s32_s12, %s32_s12 }
  0x10   :  { %p63_p5 = scmp.ne.s32.totalorder %s32_s12, %s62_s13  ;;  %p68_p7 = scmp.lt.s32.totalorder %s62_s13, %s62_s13 }
  0x12   :  { %p69_p8 = por %p68_p7, %p67_p6 }
  0x14   :  { %p70_p9 = pnand %p69_p8, %p63_p5 }
  0x16   :  { %73 = shalt.err (!%p70_p9)
}
  0x17   :  { %34 = dma.vmem_to_hbm [thread:$0]  %s32_s12, 256, %s105_s1, [#allocation4]  }
  0x18   :  { %84 = dma.done.wait [#allocation4], 256  }
  0x19   :  { %85 = vsyncadd [#allocation4], 4294967040 }
  0x1a   :  { %38 = vsyncpa [#allocation3], 1 }
  0x1b   :  { %39 = vsyncpa [#allocation4], 1 }

</bundles_post_ra>
